<compile_context>
chip_gen: v7x
topology: tpu7x:2x2x1
jax: 0.10.0
libtpu: 0.0.40
codegen_flags: <defaults>
</compile_context>

<pallas_src>
from functools import partial

import jax
import jax.numpy as jnp
from jax import lax
from jax.experimental import pallas as pl
from jax.experimental.pallas import tpu as pltpu

BN_EPS = 1e-5


# ----------------------------------------------------------------------------
# Kernel
# ----------------------------------------------------------------------------
def attention_net_kernel(
    x_ref,
    wa_ref, ba_ref,      # attention Linear (F, F) / (1, F)
    w1_ref, b1_ref,      # fc1 with BN1 folded in (F, 64) / (1, 64)
    w2_ref, b2_ref,      # fc2 with BN2 folded in (64, 32) / (1, 32)
    w3_ref, b3_ref,      # fc3 as a (1, 32) row / (1, 1)
    out_ref,             # (1, TB) lane-dense output row
    attn_ref=None,       # (TB, F) attention weights (optional output)
):
    x = x_ref[...]

    # attention_weights = softmax(attention(x), dim=1)  (softmax over features)
    logits = jnp.dot(x, wa_ref[...], preferred_element_type=jnp.float32) + ba_ref[...]
    mx = jnp.max(logits, axis=1, keepdims=True)
    ex = jnp.exp(logits - mx)
    denom = jnp.sum(ex, axis=1, keepdims=True)
    inv = 1.0 / denom            # (TB,1) exact reciprocals (keeps 1e-5 tolerance)
    attn = ex * inv              # broadcast VPU multiply instead of TB*F divides
    if attn_ref is not None:
        attn_ref[...] = attn.astype(attn_ref.dtype)

    # weighted_input = x * attention_weights
    weighted = x * attn

    # fc1+bn1 (folded) -> relu -> (dropout = identity)
    h1 = jnp.dot(weighted, w1_ref[...], preferred_element_type=jnp.float32) + b1_ref[...]
    h1 = jnp.maximum(h1, 0.0)

    # fc2+bn2 (folded) -> relu -> (dropout = identity)
    h2 = jnp.dot(h1, w2_ref[...], preferred_element_type=jnp.float32) + b2_ref[...]
    h2 = jnp.maximum(h2, 0.0)

    # fc3: (1,32) contracted with (TB,32) on the feature axis -> (1, TB) row
    # (same q@k^T contraction pattern the MXU lowering handles natively),
    # giving a lane-dense output store instead of a (TB,1) masked column.
    out_row = lax.dot_general(
        w3_ref[...], h2,
        dimension_numbers=(((1,), (1,)), ((), ())),
        preferred_element_type=jnp.float32,
    ) + b3_ref[...]
    out_ref[...] = out_row.astype(out_ref.dtype)


# ----------------------------------------------------------------------------
# Parameters (PyTorch-style init) and eval-mode BN folding
# ----------------------------------------------------------------------------
def init_linear(key, in_dim, out_dim):
    """PyTorch-style default Linear init (uniform +/- 1/sqrt(fan_in))."""
    kw, kb = jax.random.split(key)
    bound = 1.0 / jnp.sqrt(jnp.float32(in_dim))
    # Stored already transposed to (in, out) for x @ W.
    w = jax.random.uniform(kw, (in_dim, out_dim), jnp.float32, -bound, bound)
    b = jax.random.uniform(kb, (1, out_dim), jnp.float32, -bound, bound)
    return w, b


def make_params(input_size, key):
    keys = jax.random.split(key, 4)
    wa, ba = init_linear(keys[0], input_size, input_size)
    w1, b1 = init_linear(keys[1], input_size, 64)
    w2, b2 = init_linear(keys[2], 64, 32)
    w3, b3 = init_linear(keys[3], 32, 1)
    # BatchNorm1d defaults: gamma=1, beta=0, running_mean=0, running_var=1.
    g1 = jnp.ones((1, 64), jnp.float32); be1 = jnp.zeros((1, 64), jnp.float32)
    m1 = jnp.zeros((1, 64), jnp.float32); v1 = jnp.ones((1, 64), jnp.float32)
    g2 = jnp.ones((1, 32), jnp.float32); be2 = jnp.zeros((1, 32), jnp.float32)
    m2 = jnp.zeros((1, 32), jnp.float32); v2 = jnp.ones((1, 32), jnp.float32)
    return (wa, ba, w1, b1, g1, be1, m1, v1,
            w2, b2, g2, be2, m2, v2, w3, b3)


def fold_params(params):
    """Fold eval-mode BatchNorm into the preceding Linear weights/biases."""
    (wa, ba, w1, b1, g1, be1, m1, v1,
     w2, b2, g2, be2, m2, v2, w3, b3) = params
    s1 = g1 / jnp.sqrt(v1 + BN_EPS)          # (1, 64)
    w1f = w1 * s1
    b1f = (b1 - m1) * s1 + be1
    s2 = g2 / jnp.sqrt(v2 + BN_EPS)          # (1, 32)
    w2f = w2 * s2
    b2f = (b2 - m2) * s2 + be2
    w3_row = w3.T                            # (1, 32) row for the lane-dense fc3
    return (wa, ba, w1f, b1f, w2f, b2f, w3_row, b3)


# ----------------------------------------------------------------------------
# Generation-aware tiling
# ----------------------------------------------------------------------------
def _round_up(v, m):
    return (v + m - 1) // m * m


def _vmem_capacity_bytes():
    """Physical VMEM per TensorCore (trace-time query with safe fallback)."""
    try:
        return int(pltpu.get_tpu_info().vmem_capacity_bytes)
    except Exception:
        try:
            kind = jax.devices()[0].device_kind.lower()
        except Exception:
            kind = ""
        if "v5" in kind or "v6" in kind:
            return 128 * 1024 * 1024
        return 64 * 1024 * 1024              # conservative (v7x-sized) default


def _tiling(B, F, return_attention, block_rows):
    """Pick the batch-tile size TB and the scoped-VMEM limit."""
    vmem_cap = _vmem_capacity_bytes()
    # Leave headroom under physical capacity: ~48 MiB on 64 MiB (v7x),
    # ~96 MiB on 128 MiB (v5e/v6e). The scoped default (16/32 MiB) is too
    # small for the large tiles we want.
    vmem_limit = min(vmem_cap * 3 // 4, 100 * 1024 * 1024)

    # Per-batch-row f32 working set: double-buffered x tile, optional
    # double-buffered attn tile, ~4 F-wide softmax intermediates, h1 (64),
    # h2 (32) + slack. Intermediates are not pipelined, so budget ~40% of the
    # scoped limit for the batch-scaled portion.
    per_row = 4 * (2 * F + (2 * F if return_attention else 0) + 4 * F + 64 + 32 + 16)
    tb_max = (int(vmem_limit * 0.4) // per_row) // 128 * 128
    tb_max = max(512, min(tb_max, 32768))
    if block_rows is not None:
        tb_max = max(128, _round_up(block_rows, 128))

    if B <= 256:
        # One lane-aligned tile; padding cost is at most 127 dead rows.
        tb = _round_up(max(B, 1), 128)
    else:
        # >= 2 grid steps so both TensorCores get work on v7x megacore, while
        # tiles stay as large as possible to amortize the ~0.35us/step cost.
        tb = min(tb_max, _round_up(pl.cdiv(B, 2), 128))
    return tb, vmem_limit


# ----------------------------------------------------------------------------
# Forward wrapper (fully jitted: BN folding + pad + kernel + slice are fused)
# ----------------------------------------------------------------------------
@partial(jax.jit, static_argnames=("return_attention", "block_rows"))
def attention_net_forward(x, params, *, return_attention=True, block_rows=None):
    """Runs the fused AttentionNet forward. Returns (out, attn) or out."""
    B, F = x.shape
    kparams = fold_params(params)

    TB, vmem_limit = _tiling(B, F, return_attention, block_rows)
    B_pad = _round_up(B, TB)
    x_pad = jnp.pad(x, ((0, B_pad - B), (0, 0))) if B_pad != B else x
    grid = (B_pad // TB,)

    x_spec = pl.BlockSpec((TB, F), lambda i: (i, 0))
    # Weights/biases: full-array blocks, constant index -> stay VMEM-resident.
    w_specs = [pl.BlockSpec(p.shape, lambda i: (0, 0)) for p in kparams]
    out_spec = pl.BlockSpec((1, TB), lambda i: (0, i))      # lane-dense row
    attn_spec = pl.BlockSpec((TB, F), lambda i: (i, 0))

    if return_attention:
        out_shape = (jax.ShapeDtypeStruct((1, B_pad), jnp.float32),
                     jax.ShapeDtypeStruct((B_pad, F), jnp.float32))
        out_specs = (out_spec, attn_spec)
    else:
        out_shape = jax.ShapeDtypeStruct((1, B_pad), jnp.float32)
        out_specs = out_spec

    fn = pl.pallas_call(
        attention_net_kernel,
        grid=grid,
        in_specs=[x_spec] + w_specs,
        out_specs=out_specs,
        out_shape=out_shape,
        compiler_params=pltpu.CompilerParams(
            dimension_semantics=("parallel",),   # shard batch tiles across TCs
            vmem_limit_bytes=vmem_limit,         # generation-aware scoped limit
        ),
    )
    results = fn(x_pad, *kparams)

    if return_attention:
        out_row, attn = results
        return out_row[0, :B].reshape(B, 1), attn[:B]
    return results[0, :B].reshape(B, 1)


# ----------------------------------------------------------------------------
# Pure-JAX reference
# ----------------------------------------------------------------------------
def reference_forward(x, params):
    (wa, ba, w1, b1, g1, be1, m1, v1,
     w2, b2, g2, be2, m2, v2, w3, b3) = params
    logits = x @ wa + ba
    attn = jax.nn.softmax(logits, axis=1)
    weighted = x * attn
    h1 = weighted @ w1 + b1
    h1 = jnp.maximum((h1 - m1) / jnp.sqrt(v1 + BN_EPS) * g1 + be1, 0.0)
    h2 = h1 @ w2 + b2
    h2 = jnp.maximum((h2 - m2) / jnp.sqrt(v2 + BN_EPS) * g2 + be2, 0.0)
    out = h2 @ w3 + b3
    return out, attn


if __name__ == "__main__":
    key = jax.random.PRNGKey(0)
    k_x, k_p = jax.random.split(key)

    batch = 8
    input_size = 32
    x = jax.random.normal(k_x, (batch, input_size), jnp.float32)
    params = make_params(input_size, k_p)

    out, attn = attention_net_forward(x, params, return_attention=True)
    jax.block_until_ready((out, attn))

    ref_out, ref_attn = reference_forward(x, params)
    assert out.shape == (batch, 1) and attn.shape == (batch, input_size)
    assert jnp.allclose(out, ref_out, atol=1e-4, rtol=1e-4)
    assert jnp.allclose(attn, ref_attn, atol=1e-5, rtol=1e-5)

    # Odd batch size: exercises the zero-padded tile and the attn-free path.
    x2 = jax.random.normal(k_x, (5, input_size), jnp.float32)
    out2 = attention_net_forward(x2, params, return_attention=False)
    jax.block_until_ready(out2)
    ref_out2, _ = reference_forward(x2, params)
    assert out2.shape == (5, 1)
    assert jnp.allclose(out2, ref_out2, atol=1e-4, rtol=1e-4)

    # Mid-size batch: exercises the >=2-tile grid (both TensorCores on v7x).
    x3 = jax.random.normal(k_x, (300, input_size), jnp.float32)
    out3, attn3 = attention_net_forward(x3, params, return_attention=True)
    jax.block_until_ready((out3, attn3))
    ref_out3, ref_attn3 = reference_forward(x3, params)
    assert out3.shape == (300, 1) and attn3.shape == (300, input_size)
    assert jnp.allclose(out3, ref_out3, atol=1e-4, rtol=1e-4)
    assert jnp.allclose(attn3, ref_attn3, atol=1e-5, rtol=1e-5)

    print("KERNEL_OK")
</pallas_src>

<mosaic_0001>
module attributes {stable_mosaic.version = 11 : i64} {
  func.func @attention_net_kernel(%arg0: i32, %arg1: memref<128x32xf32, #tpu.memory_space<vmem>>, %arg2: memref<32x32xf32, #tpu.memory_space<vmem>>, %arg3: memref<1x32xf32, #tpu.memory_space<vmem>>, %arg4: memref<32x64xf32, #tpu.memory_space<vmem>>, %arg5: memref<1x64xf32, #tpu.memory_space<vmem>>, %arg6: memref<64x32xf32, #tpu.memory_space<vmem>>, %arg7: memref<1x32xf32, #tpu.memory_space<vmem>>, %arg8: memref<1x32xf32, #tpu.memory_space<vmem>>, %arg9: memref<1x1xf32, #tpu.memory_space<vmem>>, %arg10: memref<1x128xf32, #tpu.memory_space<vmem>>, %arg11: memref<128x32xf32, #tpu.memory_space<vmem>>) attributes {dimension_semantics = [#tpu.dimension_semantics<parallel>], iteration_bounds = array<i64: 1>, scalar_prefetch = 0 : i64, scratch_operands = 0 : i64, tpu.core_type = #tpu.core_type<tc>, window_params = [{transform_indices = @transform_0, window_bounds = array<i64: 128, 32>}, {pipeline_mode = #tpu.pipeline_mode<synchronous>, transform_indices = @transform_1, window_bounds = array<i64: 32, 32>}, {pipeline_mode = #tpu.pipeline_mode<synchronous>, transform_indices = @transform_2, window_bounds = array<i64: 1, 32>}, {pipeline_mode = #tpu.pipeline_mode<synchronous>, transform_indices = @transform_3, window_bounds = array<i64: 32, 64>}, {pipeline_mode = #tpu.pipeline_mode<synchronous>, transform_indices = @transform_4, window_bounds = array<i64: 1, 64>}, {pipeline_mode = #tpu.pipeline_mode<synchronous>, transform_indices = @transform_5, window_bounds = array<i64: 64, 32>}, {pipeline_mode = #tpu.pipeline_mode<synchronous>, transform_indices = @transform_6, window_bounds = array<i64: 1, 32>}, {pipeline_mode = #tpu.pipeline_mode<synchronous>, transform_indices = @transform_7, window_bounds = array<i64: 1, 32>}, {pipeline_mode = #tpu.pipeline_mode<synchronous>, transform_indices = @transform_8, window_bounds = array<i64: 1, 1>}, {transform_indices = @transform_9, window_bounds = array<i64: 1, 128>}, {transform_indices = @transform_10, window_bounds = array<i64: 128, 32>}]} {
    %c0 = arith.constant 0 : index
    %c0_0 = arith.constant 0 : index
    %0 = vector.load %arg1[%c0, %c0_0] : memref<128x32xf32, #tpu.memory_space<vmem>>, vector<128x32xf32>
    %c0_1 = arith.constant 0 : index
    %c0_2 = arith.constant 0 : index
    %1 = vector.load %arg2[%c0_1, %c0_2] : memref<32x32xf32, #tpu.memory_space<vmem>>, vector<32x32xf32>
    %cst = arith.constant dense<0.000000e+00> : vector<128x32xf32>
    %2 = tpu.matmul %0, %1, %cst {dimension_numbers = #tpu.dot_dimension_numbers<[1], [0], [0], [1], [0, 0, 1, 1], [], []>} : vector<128x32xf32>, vector<32x32xf32>, vector<128x32xf32> -> vector<128x32xf32>
    %c0_3 = arith.constant 0 : index
    %c0_4 = arith.constant 0 : index
    %3 = vector.load %arg3[%c0_3, %c0_4] : memref<1x32xf32, #tpu.memory_space<vmem>>, vector<1x32xf32>
    %4 = vector.broadcast %3 : vector<1x32xf32> to vector<128x32xf32>
    %5 = arith.addf %2, %4 : vector<128x32xf32>
    %cst_5 = arith.constant dense<0xFF800000> : vector<128xf32>
    %6 = vector.multi_reduction <maximumf>, %5, %cst_5 [1] : vector<128x32xf32> to vector<128xf32>
    %7 = vector.shape_cast %6 : vector<128xf32> to vector<128x1xf32>
    %8 = vector.broadcast %7 : vector<128x1xf32> to vector<128x32xf32>
    %9 = arith.subf %5, %8 : vector<128x32xf32>
    %10 = math.exp %9 : vector<128x32xf32>
    %cst_6 = arith.constant dense<0.000000e+00> : vector<128xf32>
    %11 = vector.multi_reduction <add>, %10, %cst_6 [1] : vector<128x32xf32> to vector<128xf32>
    %12 = vector.shape_cast %11 : vector<128xf32> to vector<128x1xf32>
    %cst_7 = arith.constant 1.000000e+00 : f32
    %13 = vector.broadcast %cst_7 : f32 to vector<128x1xf32>
    %14 = arith.divf %13, %12 : vector<128x1xf32>
    %15 = vector.broadcast %14 : vector<128x1xf32> to vector<128x32xf32>
    %16 = arith.mulf %10, %15 : vector<128x32xf32>
    %c0_8 = arith.constant 0 : index
    %c0_9 = arith.constant 0 : index
    %17 = vector.load %arg11[%c0_8, %c0_9] : memref<128x32xf32, #tpu.memory_space<vmem>>, vector<128x32xf32>
    tpu.vector_store %arg11[%c0_8, %c0_9], %16 {strides = array<i32>} : memref<128x32xf32, #tpu.memory_space<vmem>>, vector<128x32xf32>,
    %18 = arith.mulf %0, %16 : vector<128x32xf32>
    %c0_10 = arith.constant 0 : index
    %c0_11 = arith.constant 0 : index
    %19 = vector.load %arg4[%c0_10, %c0_11] : memref<32x64xf32, #tpu.memory_space<vmem>>, vector<32x64xf32>
    %cst_12 = arith.constant dense<0.000000e+00> : vector<128x64xf32>
    %20 = tpu.matmul %18, %19, %cst_12 {dimension_numbers = #tpu.dot_dimension_numbers<[1], [0], [0], [1], [0, 0, 1, 1], [], []>} : vector<128x32xf32>, vector<32x64xf32>, vector<128x64xf32> -> vector<128x64xf32>
    %c0_13 = arith.constant 0 : index
    %c0_14 = arith.constant 0 : index
    %21 = vector.load %arg5[%c0_13, %c0_14] : memref<1x64xf32, #tpu.memory_space<vmem>>, vector<1x64xf32>
    %22 = vector.broadcast %21 : vector<1x64xf32> to vector<128x64xf32>
    %23 = arith.addf %20, %22 : vector<128x64xf32>
    %cst_15 = arith.constant 0.000000e+00 : f32
    %24 = vector.broadcast %cst_15 : f32 to vector<128x64xf32>
    %25 = arith.maximumf %23, %24 : vector<128x64xf32>
    %c0_16 = arith.constant 0 : index
    %c0_17 = arith.constant 0 : index
    %26 = vector.load %arg6[%c0_16, %c0_17] : memref<64x32xf32, #tpu.memory_space<vmem>>, vector<64x32xf32>
    %cst_18 = arith.constant dense<0.000000e+00> : vector<128x32xf32>
    %27 = tpu.matmul %25, %26, %cst_18 {dimension_numbers = #tpu.dot_dimension_numbers<[1], [0], [0], [1], [0, 0, 1, 1], [], []>} : vector<128x64xf32>, vector<64x32xf32>, vector<128x32xf32> -> vector<128x32xf32>
    %c0_19 = arith.constant 0 : index
    %c0_20 = arith.constant 0 : index
    %28 = vector.load %arg7[%c0_19, %c0_20] : memref<1x32xf32, #tpu.memory_space<vmem>>, vector<1x32xf32>
    %29 = vector.broadcast %28 : vector<1x32xf32> to vector<128x32xf32>
    %30 = arith.addf %27, %29 : vector<128x32xf32>
    %cst_21 = arith.constant 0.000000e+00 : f32
    %31 = vector.broadcast %cst_21 : f32 to vector<128x32xf32>
    %32 = arith.maximumf %30, %31 : vector<128x32xf32>
    %c0_22 = arith.constant 0 : index
    %c0_23 = arith.constant 0 : index
    %33 = vector.load %arg8[%c0_22, %c0_23] : memref<1x32xf32, #tpu.memory_space<vmem>>, vector<1x32xf32>
    %cst_24 = arith.constant dense<0.000000e+00> : vector<1x128xf32>
    %34 = tpu.matmul %33, %32, %cst_24 {dimension_numbers = #tpu.dot_dimension_numbers<[1], [1], [0], [0], [0, 0, 1, 0], [], []>} : vector<1x32xf32>, vector<128x32xf32>, vector<1x128xf32> -> vector<1x128xf32>
    %c0_25 = arith.constant 0 : index
    %c0_26 = arith.constant 0 : index
    %35 = vector.load %arg9[%c0_25, %c0_26] : memref<1x1xf32, #tpu.memory_space<vmem>>, vector<1x1xf32>
    %36 = vector.broadcast %35 : vector<1x1xf32> to vector<1x128xf32>
    %37 = arith.addf %34, %36 : vector<1x128xf32>
    %c0_27 = arith.constant 0 : index
    %c0_28 = arith.constant 0 : index
    %38 = vector.load %arg10[%c0_27, %c0_28] : memref<1x128xf32, #tpu.memory_space<vmem>>, vector<1x128xf32>
    tpu.vector_store %arg10[%c0_27, %c0_28], %37 {strides = array<i32>} : memref<1x128xf32, #tpu.memory_space<vmem>>, vector<1x128xf32>,
    return
  }
  func.func @transform_0(%arg0: i32) -> (i32, i32) {
    %c0_i32 = arith.constant 0 : i32
    %c0_i32_0 = arith.constant 0 : i32
    return %arg0, %c0_i32 : i32, i32
  }
  func.func @transform_1(%arg0: i32) -> (i32, i32) {
    %c0_i32 = arith.constant 0 : i32
    %c0_i32_0 = arith.constant 0 : i32
    %c0_i32_1 = arith.constant 0 : i32
    return %c0_i32, %c0_i32_0 : i32, i32
  }
  func.func @transform_2(%arg0: i32) -> (i32, i32) {
    %c0_i32 = arith.constant 0 : i32
    %c0_i32_0 = arith.constant 0 : i32
    %c0_i32_1 = arith.constant 0 : i32
    return %c0_i32, %c0_i32_0 : i32, i32
  }
  func.func @transform_3(%arg0: i32) -> (i32, i32) {
    %c0_i32 = arith.constant 0 : i32
    %c0_i32_0 = arith.constant 0 : i32
    %c0_i32_1 = arith.constant 0 : i32
    return %c0_i32, %c0_i32_0 : i32, i32
  }
  func.func @transform_4(%arg0: i32) -> (i32, i32) {
    %c0_i32 = arith.constant 0 : i32
    %c0_i32_0 = arith.constant 0 : i32
    %c0_i32_1 = arith.constant 0 : i32
    return %c0_i32, %c0_i32_0 : i32, i32
  }
  func.func @transform_5(%arg0: i32) -> (i32, i32) {
    %c0_i32 = arith.constant 0 : i32
    %c0_i32_0 = arith.constant 0 : i32
    %c0_i32_1 = arith.constant 0 : i32
    return %c0_i32, %c0_i32_0 : i32, i32
  }
  func.func @transform_6(%arg0: i32) -> (i32, i32) {
    %c0_i32 = arith.constant 0 : i32
    %c0_i32_0 = arith.constant 0 : i32
    %c0_i32_1 = arith.constant 0 : i32
    return %c0_i32, %c0_i32_0 : i32, i32
  }
  func.func @transform_7(%arg0: i32) -> (i32, i32) {
    %c0_i32 = arith.constant 0 : i32
    %c0_i32_0 = arith.constant 0 : i32
    %c0_i32_1 = arith.constant 0 : i32
    return %c0_i32, %c0_i32_0 : i32, i32
  }
  func.func @transform_8(%arg0: i32) -> (i32, i32) {
    %c0_i32 = arith.constant 0 : i32
    %c0_i32_0 = arith.constant 0 : i32
    %c0_i32_1 = arith.constant 0 : i32
    return %c0_i32, %c0_i32_0 : i32, i32
  }
  func.func @transform_9(%arg0: i32) -> (i32, i32) {
    %c0_i32 = arith.constant 0 : i32
    %c0_i32_0 = arith.constant 0 : i32
    return %c0_i32, %arg0 : i32, i32
  }
  func.func @transform_10(%arg0: i32) -> (i32, i32) {
    %c0_i32 = arith.constant 0 : i32
    %c0_i32_0 = arith.constant 0 : i32
    return %arg0, %c0_i32 : i32, i32
  }
}

</mosaic_0001>

<bundles_post_ra>
// kernel: attention_net_forward.1
= control target key start
LH: loop header
LB: loop body
LE: loop exit
PB: predicated region body
PF: predicated region fallthrough
CT: control target
= control target key end

     0   :  { %vm63_vm0 = vcmask 261120   ;;  %vm716_vm1 = vcmask 523264   ;;  %vm1489_vm2 = vmmov 0   ;;  %s2028_s1 = inlined_call_operand.vmem [shape: f32[32,32], index: 1, kind: input, shape index: {}]   ;;  %s2029_s0 = inlined_call_operand.vmem [shape: f32[128,32], index: 0, kind: input, shape index: {}]   ;;  %s2030_s2 = inlined_call_operand.vmem [shape: f32[1,32], index: 2, kind: input, shape index: {}]   ;;  %s2031_s3 = inlined_call_operand.vmem [shape: f32[32,64], index: 3, kind: input, shape index: {}]   ;;  %s2032_s5 = inlined_call_operand.vmem [shape: f32[64,32], index: 5, kind: input, shape index: {}]   ;;  %s2033_s10 = inlined_call_operand.vmem [shape: f32[128,32], index: 10, kind: output, shape index: {1}]   ;;  %s2034_s4 = inlined_call_operand.vmem [shape: f32[1,64], index: 4, kind: input, shape index: {}]   ;;  %s2035_s8 = inlined_call_operand.<no memory space> [shape: f32[1,1], index: 8, kind: input, shape index: {}]   ;;  %s2036_s6 = inlined_call_operand.vmem [shape: f32[1,32], index: 6, kind: input, shape index: {}]   ;;  %s2037_s7 = inlined_call_operand.vmem [shape: f32[1,32], index: 7, kind: input, shape index: {}]   ;;  %s2038_s9 = inlined_call_operand.vmem [shape: f32[1,128], index: 9, kind: output, shape index: {0}]  }
   0x1   :  { %v52_v0 = vld [vmem:[%s2028_s1] sm:$0xff]  ;;  %v53_v1 = vld [vmem:[%s2028_s1 + $0x8] sm:$0xff]  ;;  %v54_v2 = vld [vmem:[%s2028_s1 + $0x10] sm:$0xff] }
   0x2   :  { %v1355_v3 = vpack.c.bf16 %v53_v1, %v52_v0  ;;  %v55_v4 = vld [vmem:[%s2028_s1 + $0x18] sm:$0xff]  ;;  %v1562_v5 = vld [vmem:[%s2029_s0] sm:$0xff]  ;;  %v1569_v7 = vld [vmem:[%s2029_s0 + $0x8] sm:$0xff] }
   0x3   :  { %v1359_v6 = vpack.c.bf16 %v55_v4, %v54_v2  ;;  %1224 = vmatprep.mubr.msk.f32.mxu0 %vm63_vm0, %v1562_v5  ;;  %v1574_v8 = vld [vmem:[%s2029_s0 + $0x10] sm:$0xff]  ;;  %v1583_v9 = vld [vmem:[%s2029_s0 + $0x18] sm:$0xff]  ;;  %v1588_v10 = vld [vmem:[%s2029_s0 + $0x20] sm:$0xff] }
   0x4   :  { %1356 = vmatprep.subr.bf16.mxu0 %v1355_v3  ;;  %v1597_v11 = vld [vmem:[%s2029_s0 + $0x28] sm:$0xff]  ;;  %v1602_v12 = vld [vmem:[%s2029_s0 + $0x30] sm:$0xff]  ;;  %v1611_v13 = vld [vmem:[%s2029_s0 + $0x38] sm:$0xff] }
   0x5   :  { %1358 = vmatpush3.bf16.msra.mxu0 %v1355_v3  ;;  %v1616_v14 = vld [vmem:[%s2029_s0 + $0x40] sm:$0xff]  ;;  %v1625_v15 = vld [vmem:[%s2029_s0 + $0x48] sm:$0xff]  ;;  %v1630_v16 = vld [vmem:[%s2029_s0 + $0x50] sm:$0xff] }
   0x6   :  { %1360 = vmatprep.subr.bf16.mxu0 %v1359_v6  ;;  %v1639_v17 = vld [vmem:[%s2029_s0 + $0x58] sm:$0xff]  ;;  %v1644_v18 = vld [vmem:[%s2029_s0 + $0x60] sm:$0xff]  ;;  %v1653_v19 = vld [vmem:[%s2029_s0 + $0x68] sm:$0xff] }
   0x7   :  { %v1658_v20 = vld [vmem:[%s2029_s0 + $0x70] sm:$0xff]  ;;  %v1667_v21 = vld [vmem:[%s2029_s0 + $0x78] sm:$0xff]  ;;  %v1067_v22 = vld [vmem:[%s2030_s2] ss:$0 sm:$0xff] }
   0x8   :  { %vm1994_vm3 = vmpackc.low %vm63_vm0, %vm63_vm0 }
   0x9   :  { %1362 = vmatpush3.bf16.msra.mxu0 %v1359_v6 }
   0xc   :  { %1225 = vmatmul.mubr.msk.f32.vlgmr.msra.gmra.mrb[0].mxu0 %vm63_vm0, %v1569_v7 }
   0xd   :  { %1227 = vmatprep.mubr.msk.f32.mxu0 %vm63_vm0, %v1574_v8 }
  0x10   :  { %1228 = vmatmul.mubr.msk.f32.gmra.mrb[2].mxu0 %vm63_vm0, %v1583_v9 }
  0x11   :  { %1230 = vmatprep.mubr.msk.f32.mxu0 %vm63_vm0, %v1588_v10 }
  0x14   :  { %1231 = vmatmul.mubr.msk.f32.gmra.mrb[4].mxu0 %vm63_vm0, %v1597_v11 }
  0x15   :  { %1233 = vmatprep.mubr.msk.f32.mxu0 %vm63_vm0, %v1602_v12 }
  0x18   :  { %1234 = vmatmul.mubr.msk.f32.gmra.mrb[6].mxu0 %vm63_vm0, %v1611_v13 }
  0x19   :  { %1236 = vmatprep.mubr.msk.f32.mxu0 %vm63_vm0, %v1616_v14 }
  0x1c   :  { %1237 = vmatmul.mubr.msk.f32.gmra.mrb[8].mxu0 %vm63_vm0, %v1625_v15 }
  0x1d   :  { %1239 = vmatprep.mubr.msk.f32.mxu0 %vm63_vm0, %v1630_v16 }
  0x20   :  { %1240 = vmatmul.mubr.msk.f32.gmra.mrb[10].mxu0 %vm63_vm0, %v1639_v17 }
  0x21   :  { %1242 = vmatprep.mubr.msk.f32.mxu0 %vm63_vm0, %v1644_v18 }
  0x24   :  { %1243 = vmatmul.mubr.msk.f32.gmra.mrb[12].mxu0 %vm63_vm0, %v1653_v19 }
  0x25   :  { %1245 = vmatprep.mubr.msk.f32.mxu0 %vm63_vm0, %v1658_v20 }
  0x28   :  { %1246 = vmatmul.mubr.msk.f32.gmra.mrb[14].mxu0 %vm63_vm0, %v1667_v21 }
  0xdf   :  { %v1226_v23 = vpop.f32.mrb[0].mxu0 }
  0xe0   :  { %v178_v24 = vpop.f32.mrb[1].mxu0  ;;  %v1676_v26 = vadd.f32 %v1226_v23, %v1067_v22 }
  0xe1   :  { %v1674_v25 = vadd.f32 %v1067_v22, %v178_v24 }
  0xe2   :  { %v260_v34 = vsel %vm63_vm0, %v1676_v26, -inf }
  0xe3   :  { %v1229_v27 = vpop.f32.mrb[2].mxu0  ;;  %v257_v28 = vsel %vm63_vm0, %v1674_v25, -inf }
  0xe4   :  { %v188_v29 = vpop.f32.mrb[3].mxu0  ;;  %258 = vmax.xlane.f32.xlu0 %v257_v28  ;;  %v1680_v30 = vadd.f32 %v1229_v27, %v1067_v22 }
  0xe5   :  { %v1682_v31 = vadd.f32 %v1067_v22, %v188_v29 }
  0xe6   :  { %v266_v38 = vsel %vm63_vm0, %v1680_v30, -inf }
  0xe7   :  { %v1232_v32 = vpop.f32.mrb[4].mxu0  ;;  %v263_v33 = vsel %vm63_vm0, %v1682_v31, -inf }
  0xe8   :  { %v198_v35 = vpop.f32.mrb[5].mxu0  ;;  %264 = vmax.xlane.f32.xlu1 %v263_v33  ;;  %261 = vmax.xlane.f32.xlu0 %v260_v34  ;;  %v1688_v36 = vadd.f32 %v1232_v32, %v1067_v22 }
  0xe9   :  { %v1690_v37 = vadd.f32 %v1067_v22, %v198_v35 }
  0xea   :  { %v272_v44 = vsel %vm63_vm0, %v1688_v36, -inf }
  0xeb   :  { %v1235_v39 = vpop.f32.mrb[6].mxu0  ;;  %v269_v40 = vsel %vm63_vm0, %v1690_v37, -inf }
  0xec   :  { %v208_v41 = vpop.f32.mrb[7].mxu0  ;;  %267 = vmax.xlane.f32.xlu1 %v266_v38  ;;  %270 = vmax.xlane.f32.xlu0 %v269_v40  ;;  %v1696_v42 = vadd.f32 %v1235_v39, %v1067_v22 }
  0xed   :  { %v1698_v43 = vadd.f32 %v1067_v22, %v208_v41 }
  0xee   :  { %v278_v50 = vsel %vm63_vm0, %v1696_v42, -inf }
  0xef   :  { %v1238_v45 = vpop.f32.mrb[8].mxu0  ;;  %v275_v46 = vsel %vm63_vm0, %v1698_v43, -inf }
  0xf0   :  { %v218_v47 = vpop.f32.mrb[9].mxu0  ;;  %273 = vmax.xlane.f32.xlu1 %v272_v44  ;;  %276 = vmax.xlane.f32.xlu0 %v275_v46  ;;  %v1704_v48 = vadd.f32 %v1238_v45, %v1067_v22 }
  0xf1   :  { %v1706_v49 = vadd.f32 %v1067_v22, %v218_v47 }
  0xf2   :  { %v284_v56 = vsel %vm63_vm0, %v1704_v48, -inf }
  0xf3   :  { %v1241_v51 = vpop.f32.mrb[10].mxu0  ;;  %v281_v52 = vsel %vm63_vm0, %v1706_v49, -inf }
  0xf4   :  { %v228_v53 = vpop.f32.mrb[11].mxu0  ;;  %279 = vmax.xlane.f32.xlu1 %v278_v50  ;;  %282 = vmax.xlane.f32.xlu0 %v281_v52  ;;  %v1712_v54 = vadd.f32 %v1241_v51, %v1067_v22 }
  0xf5   :  { %v1714_v55 = vadd.f32 %v1067_v22, %v228_v53 }
  0xf6   :  { %v290_v62 = vsel %vm63_vm0, %v1712_v54, -inf }
  0xf7   :  { %v1244_v57 = vpop.f32.mrb[12].mxu0  ;;  %v287_v58 = vsel %vm63_vm0, %v1714_v55, -inf }
  0xf8   :  { %v238_v59 = vpop.f32.mrb[13].mxu0  ;;  %285 = vmax.xlane.f32.xlu1 %v284_v56  ;;  %288 = vmax.xlane.f32.xlu0 %v287_v58  ;;  %v1720_v60 = vadd.f32 %v1244_v57, %v1067_v22 }
  0xf9   :  { %v1722_v61 = vadd.f32 %v1067_v22, %v238_v59 }
  0xfa   :  { %v296_v4 = vsel %vm63_vm0, %v1720_v60, -inf }
  0xfb   :  { %v1247_v63 = vpop.f32.mrb[14].mxu0  ;;  %v293_v0 = vsel %vm63_vm0, %v1722_v61, -inf }
  0xfc   :  { %v248_v1 = vpop.f32.mrb[15].mxu0  ;;  %291 = vmax.xlane.f32.xlu1 %v290_v62  ;;  %294 = vmax.xlane.f32.xlu0 %v293_v0  ;;  %v1728_v2 = vadd.f32 %v1247_v63, %v1067_v22 }
  0xfd   :  { %v1730_v3 = vadd.f32 %v1067_v22, %v248_v1 }
  0xfe   :  { %v302_v23 = vsel %vm63_vm0, %v1728_v2, -inf }
  0xff   :  { %v299_v6 = vsel %vm63_vm0, %v1730_v3, -inf }
 0x100   :  { %297 = vmax.xlane.f32.xlu1 %v296_v4  ;;  %300 = vmax.xlane.f32.xlu0 %v299_v6 }
 0x104   :  { %303 = vmax.xlane.f32.xlu1 %v302_v23 }
 0x171   :  { %v259_v24 = vpop.xlane.xlu0 %258 }
 0x172   :  { %v305_v27 = vsub.f32 %v1674_v25, %v259_v24 }
 0x174   :  { %v321_v28 = vmul.f32 1.442695, %v305_v27 }
 0x175   :  { %v265_v29 = vpop.xlane.xlu1 %264  ;;  %v262_v32 = vpop.xlane.xlu0 %261 }
 0x176   :  { %1424 = vpow2.f32 %v321_v28  ;;  %v307_v22 = vsub.f32 %v1682_v31, %v265_v29  ;;  %v306_v33 = vsub.f32 %v1676_v26, %v262_v32 }
 0x178   :  { %v325_v34 = vmul.f32 1.442695, %v307_v22  ;;  %v323_v35 = vmul.f32 1.442695, %v306_v33 }
 0x179   :  { %v268_v38 = vpop.xlane.xlu1 %267  ;;  %v271_v39 = vpop.xlane.xlu0 %270 }
 0x17a   :  { %1426 = vpow2.f32 %v325_v34  ;;  %v308_v40 = vsub.f32 %v1680_v30, %v268_v38  ;;  %v309_v41 = vsub.f32 %v1690_v37, %v271_v39 }
 0x17b   :  { %1428 = vpow2.f32 %v323_v35 }
 0x17c   :  { %v327_v44 = vmul.f32 1.442695, %v308_v40  ;;  %v329_v25 = vmul.f32 1.442695, %v309_v41 }
 0x17d   :  { %v274_v45 = vpop.xlane.xlu1 %273  ;;  %v277_v46 = vpop.xlane.xlu0 %276 }
 0x17e   :  { %1430 = vpow2.f32 %v327_v44  ;;  %v310_v47 = vsub.f32 %v1688_v36, %v274_v45  ;;  %v311_v31 = vsub.f32 %v1698_v43, %v277_v46 }
 0x17f   :  { %1432 = vpow2.f32 %v329_v25 }
 0x180   :  { %v1745_v26 = vpop.eup %1424  ;;  %v331_v50 = vmul.f32 1.442695, %v310_v47  ;;  %v333_v51 = vmul.f32 1.442695, %v311_v31 }
 0x181   :  { %v280_v52 = vpop.xlane.xlu1 %279  ;;  %v283_v53 = vpop.xlane.xlu0 %282  ;;  %v353_v30 = vsel %vm63_vm0, %v1745_v26, 0.0 }
 0x182   :  { %1434 = vpow2.f32 %v331_v50  ;;  %v312_v37 = vsub.f32 %v1696_v42, %v280_v52  ;;  %v313_v56 = vsub.f32 %v1706_v49, %v283_v53  ;;  %354 = vadd.xlane.f32.xlu0 %v353_v30 }
 0x183   :  { %1436 = vpow2.f32 %v333_v51 }
 0x184   :  { %v1751_v36 = vpop.eup %1426  ;;  %v335_v43 = vmul.f32 1.442695, %v312_v37  ;;  %v337_v57 = vmul.f32 1.442695, %v313_v56 }
 0x185   :  { %v1753_v58 = vpop.eup %1428  ;;  %v286_v59 = vpop.xlane.xlu1 %285  ;;  %v359_v63 = vsel %vm63_vm0, %v1751_v36, 0.0 }
 0x186   :  { %v289_v62 = vpop.xlane.xlu0 %288  ;;  %1438 = vpow2.f32 %v335_v43  ;;  %v314_v0 = vsub.f32 %v1704_v48, %v286_v59  ;;  %360 = vadd.xlane.f32.xlu0 %v359_v63  ;;  %v356_v49 = vsel %vm63_vm0, %v1753_v58, 0.0  ;;  %v481_v43 = vld [vmem:[%s2031_s3] sm:$0xff] }
 0x187   :  { %v315_v42 = vsub.f32 %v1714_v55, %v289_v62  ;;  %1440 = vpow2.f32 %v337_v57  ;;  %357 = vadd.xlane.f32.xlu1 %v356_v49  ;;  %v482_v57 = vld [vmem:[%s2031_s3 + $0x8] sm:$0xff]  ;;  %v483_v49 = vld [vmem:[%s2031_s3 + $0x10] sm:$0xff] }
 0x188   :  { %v1761_v1 = vpop.eup %1430  ;;  %v339_v4 = vmul.f32 1.442695, %v314_v0  ;;  %v1363_v59 = vpack.c.bf16 %v482_v57, %v481_v43 }
 0x189   :  { %v341_v6 = vmul.f32 1.442695, %v315_v42  ;;  %v1763_v23 = vpop.eup %1432  ;;  %v292_v24 = vpop.xlane.xlu1 %291  ;;  %v362_v28 = vsel %vm63_vm0, %v1761_v1, 0.0 }
 0x18a   :  { %v295_v27 = vpop.xlane.xlu0 %294  ;;  %1442 = vpow2.f32 %v339_v4  ;;  %v316_v48 = vsub.f32 %v1712_v54, %v292_v24  ;;  %v365_v29 = vsel %vm63_vm0, %v1763_v23, 0.0  ;;  %1364 = vmatprep.subr.bf16.mxu1 %v1363_v59  ;;  %v484_v4 = vld [vmem:[%s2031_s3 + $0x18] sm:$0xff] }
 0x18b   :  { %v317_v55 = vsub.f32 %v1722_v61, %v295_v27  ;;  %1444 = vpow2.f32 %v341_v6  ;;  %363 = vadd.xlane.f32.xlu1 %v362_v28  ;;  %366 = vadd.xlane.f32.xlu0 %v365_v29  ;;  %v1367_v6 = vpack.c.bf16 %v484_v4, %v483_v49  ;;  %v701_v28 = vld [vmem:[%s2032_s5] sm:$0xff] }
 0x18c   :  { %v1771_v32 = vpop.eup %1434  ;;  %v343_v22 = vmul.f32 1.442695, %v316_v48  ;;  %1366 = vmatpush3.bf16.msra.mxu1 %v1363_v59  ;;  %v702_v48 = vld [vmem:[%s2032_s5 + $0x8] sm:$0xff] }
 0x18d   :  { %v345_v33 = vmul.f32 1.442695, %v317_v55  ;;  %v1773_v34 = vpop.eup %1436  ;;  %v298_v35 = vpop.xlane.xlu1 %297  ;;  %v368_v39 = vsel %vm63_vm0, %v1771_v32, 0.0  ;;  %1368 = vmatprep.subr.bf16.mxu1 %v1367_v6  ;;  %v703_v55 = vld [vmem:[%s2032_s5 + $0x10] sm:$0xff]  ;;  %v1371_v29 = vpack.c.bf16 %v702_v48, %v701_v28 }
 0x18e   :  { %v301_v38 = vpop.xlane.xlu0 %300  ;;  %1446 = vpow2.f32 %v343_v22  ;;  %v318_v54 = vsub.f32 %v1720_v60, %v298_v35  ;;  %v371_v40 = vsel %vm63_vm0, %v1773_v34, 0.0  ;;  %v704_v22 = vld [vmem:[%s2032_s5 + $0x18] sm:$0xff]  ;;  %v705_v35 = vld [vmem:[%s2032_s5 + $0x20] sm:$0xff] }
 0x18f   :  { %v319_v61 = vsub.f32 %v1730_v3, %v301_v38  ;;  %1448 = vpow2.f32 %v345_v33  ;;  %369 = vadd.xlane.f32.xlu1 %v368_v39  ;;  %372 = vadd.xlane.f32.xlu0 %v371_v40  ;;  %v1375_v33 = vpack.c.bf16 %v704_v22, %v703_v55  ;;  %v706_v38 = vld [vmem:[%s2032_s5 + $0x28] sm:$0xff] }
 0x190   :  { %v1781_v41 = vpop.eup %1438  ;;  %v347_v44 = vmul.f32 1.442695, %v318_v54  ;;  %1370 = vmatpush3.bf16.msra.mxu1 %v1367_v6  ;;  %1372 = vmatprep.subr.bf16.mxu0 %v1371_v29  ;;  %v1379_v39 = vpack.c.bf16 %v706_v38, %v705_v35  ;;  %v707_v54 = vld [vmem:[%s2032_s5 + $0x30] sm:$0xff] }
 0x191   :  { %v349_v25 = vmul.f32 1.442695, %v319_v61  ;;  %v1783_v45 = vpop.eup %1440  ;;  %v304_v46 = vpop.xlane.xlu1 %303  ;;  %v374_v47 = vsel %vm63_vm0, %v1781_v41, 0.0  ;;  %1374 = vmatpush3.bf16.msra.mxu0 %v1371_v29  ;;  %v708_v61 = vld [vmem:[%s2032_s5 + $0x38] sm:$0xff] }
 0x192   :  { %1450 = vpow2.f32 %v347_v44  ;;  %v320_v60 = vsub.f32 %v1728_v2, %v304_v46  ;;  %v377_v3 = vsel %vm63_vm0, %v1783_v45, 0.0  ;;  %1376 = vmatprep.subr.bf16.mxu0 %v1375_v33  ;;  %v1383_v40 = vpack.c.bf16 %v708_v61, %v707_v54 }
 0x193   :  { %1452 = vpow2.f32 %v349_v25  ;;  %375 = vadd.xlane.f32.xlu1 %v374_v47  ;;  %378 = vadd.xlane.f32.xlu0 %v377_v3 }
 0x194   :  { %v1790_v31 = vpop.eup %1442  ;;  %v351_v50 = vmul.f32 1.442695, %v320_v60 }
 0x195   :  { %v1792_v51 = vpop.eup %1444  ;;  %v380_v52 = vsel %vm63_vm0, %v1790_v31, 0.0  ;;  %1378 = vmatpush3.bf16.msra.mxu0 %v1375_v33 }
 0x196   :  { %1454 = vpow2.f32 %v351_v50  ;;  %v383_v53 = vsel %vm63_vm0, %v1792_v51, 0.0  ;;  %1380 = vmatprep.subr.bf16.mxu0 %v1379_v39 }
 0x197   :  { %381 = vadd.xlane.f32.xlu1 %v380_v52  ;;  %384 = vadd.xlane.f32.xlu0 %v383_v53 }
 0x198   :  { %v1798_v2 = vpop.eup %1446 }
 0x199   :  { %v1800_v30 = vpop.eup %1448  ;;  %v386_v37 = vsel %vm63_vm0, %v1798_v2, 0.0  ;;  %1382 = vmatpush3.bf16.msra.mxu0 %v1379_v39 }
 0x19a   :  { %v389_v56 = vsel %vm63_vm0, %v1800_v30, 0.0  ;;  %1384 = vmatprep.subr.bf16.mxu0 %v1383_v40 }
 0x19b   :  { %387 = vadd.xlane.f32.xlu1 %v386_v37  ;;  %390 = vadd.xlane.f32.xlu0 %v389_v56 }
 0x19c   :  { %v1812_v62 = vpop.eup %1450 }
 0x19d   :  { %v1814_v63 = vpop.eup %1452  ;;  %v392_v0 = vsel %vm63_vm0, %v1812_v62, 0.0  ;;  %1386 = vmatpush3.bf16.msra.mxu0 %v1383_v40 }
 0x19e   :  { %v395_v42 = vsel %vm63_vm0, %v1814_v63, 0.0 }
 0x19f   :  { %393 = vadd.xlane.f32.xlu1 %v392_v0  ;;  %396 = vadd.xlane.f32.xlu0 %v395_v42 }
 0x1a0   :  { %v1826_v24 = vpop.eup %1454 }
 0x1a1   :  { %v398_v27 = vsel %vm63_vm0, %v1826_v24, 0.0 }
 0x1a3   :  { %399 = vadd.xlane.f32.xlu1 %v398_v27 }
 0x20f   :  { %v355_v44 = vpop.xlane.xlu0 %354 }
 0x210   :  { %1456 = vrcp.f32 %v355_v44 }
 0x213   :  { %v361_v25 = vpop.xlane.xlu0 %360 }
 0x214   :  { %v358_v46 = vpop.xlane.xlu1 %357  ;;  %1458 = vrcp.f32 %v361_v25 }
 0x215   :  { %1460 = vrcp.f32 %v358_v46 }
 0x218   :  { %v364_v47 = vpop.xlane.xlu1 %363  ;;  %v367_v60 = vpop.xlane.xlu0 %366 }
 0x219   :  { %1462 = vrcp.f32 %v364_v47 }
 0x21a   :  { %v1457_v3 = vpop.eup %1456  ;;  %1464 = vrcp.f32 %v367_v60 }
 0x21b   :  { %v433_v50 = vmul.f32 %v1457_v3, %v1745_v26 }
 0x21c   :  { %v370_v52 = vpop.xlane.xlu1 %369  ;;  %v373_v53 = vpop.xlane.xlu0 %372 }
 0x21d   :  { %1466 = vrcp.f32 %v370_v52  ;;  %449 = vst.msk [vmem:[%s2033_s10] sm:$0xff] %vm63_vm0, %v433_v50  ;;  %v465_v37 = vmul.f32 %v433_v50, %v1562_v5 }
 0x21e   :  { %v1459_v56 = vpop.eup %1458  ;;  %1468 = vrcp.f32 %v373_v53 }
 0x21f   :  { %v1461_v43 = vpop.eup %1460  ;;  %1256 = vmatprep.mubr.msk.f32.mxu1 %vm63_vm0, %v465_v37  ;;  %v435_v57 = vmul.f32 %v1459_v56, %v1751_v36 }
 0x220   :  { %v376_v59 = vpop.xlane.xlu1 %375  ;;  %v379_v0 = vpop.xlane.xlu0 %378  ;;  %v434_v26 = vmul.f32 %v1461_v43, %v1753_v58 }
 0x221   :  { %1470 = vrcp.f32 %v376_v59  ;;  %451 = vst.msk [vmem:[%s2033_s10 + $0x10] sm:$0xff] %vm63_vm0, %v435_v57  ;;  %v467_v42 = vmul.f32 %v435_v57, %v1574_v8 }
 0x222   :  { %1472 = vrcp.f32 %v379_v0  ;;  %450 = vst.msk [vmem:[%s2033_s10 + $0x8] sm:$0xff] %vm63_vm0, %v434_v26  ;;  %v466_v5 = vmul.f32 %v434_v26, %v1569_v7 }
 0x223   :  { %v1463_v36 = vpop.eup %1462 }
 0x224   :  { %v1465_v49 = vpop.eup %1464  ;;  %v382_v4 = vpop.xlane.xlu1 %381  ;;  %1257 = vmatmul.mubr.msk.f32.vlgmr.msra.gmra.mrb[0].mxu1 %vm63_vm0, %v466_v5  ;;  %v436_v6 = vmul.f32 %v1463_v36, %v1761_v1 }
 0x225   :  { %v385_v58 = vpop.xlane.xlu0 %384  ;;  %1474 = vrcp.f32 %v382_v4  ;;  %1259 = vmatprep.mubr.msk.f32.mxu1 %vm63_vm0, %v467_v42  ;;  %v437_v8 = vmul.f32 %v1465_v49, %v1763_v23 }
 0x226   :  { %1476 = vrcp.f32 %v385_v58  ;;  %452 = vst.msk [vmem:[%s2033_s10 + $0x18] sm:$0xff] %vm63_vm0, %v436_v6  ;;  %v468_v7 = vmul.f32 %v436_v6, %v1583_v9 }
 0x227   :  { %v1467_v27 = vpop.eup %1466  ;;  %453 = vst.msk [vmem:[%s2033_s10 + $0x20] sm:$0xff] %vm63_vm0, %v437_v8  ;;  %v469_v1 = vmul.f32 %v437_v8, %v1588_v10 }
 0x228   :  { %v1469_v28 = vpop.eup %1468  ;;  %v388_v48 = vpop.xlane.xlu1 %387  ;;  %1260 = vmatmul.mubr.msk.f32.gmra.mrb[2].mxu1 %vm63_vm0, %v468_v7  ;;  %v438_v55 = vmul.f32 %v1467_v27, %v1771_v32 }
 0x229   :  { %v391_v23 = vpop.xlane.xlu0 %390  ;;  %1478 = vrcp.f32 %v388_v48  ;;  %1262 = vmatprep.mubr.msk.f32.mxu1 %vm63_vm0, %v469_v1  ;;  %v439_v9 = vmul.f32 %v1469_v28, %v1773_v34 }
 0x22a   :  { %1480 = vrcp.f32 %v391_v23  ;;  %454 = vst.msk [vmem:[%s2033_s10 + $0x28] sm:$0xff] %vm63_vm0, %v438_v55  ;;  %v470_v10 = vmul.f32 %v438_v55, %v1597_v11 }
 0x22b   :  { %v1471_v29 = vpop.eup %1470  ;;  %455 = vst.msk [vmem:[%s2033_s10 + $0x30] sm:$0xff] %vm63_vm0, %v439_v9  ;;  %v471_v32 = vmul.f32 %v439_v9, %v1602_v12 }
 0x22c   :  { %v1473_v22 = vpop.eup %1472  ;;  %v394_v33 = vpop.xlane.xlu1 %393  ;;  %1263 = vmatmul.mubr.msk.f32.gmra.mrb[4].mxu1 %vm63_vm0, %v470_v10  ;;  %v440_v35 = vmul.f32 %v1471_v29, %v1781_v41 }
 0x22d   :  { %v397_v34 = vpop.xlane.xlu0 %396  ;;  %1482 = vrcp.f32 %v394_v33  ;;  %1265 = vmatprep.mubr.msk.f32.mxu1 %vm63_vm0, %v471_v32  ;;  %v441_v11 = vmul.f32 %v1473_v22, %v1783_v45 }
 0x22e   :  { %1484 = vrcp.f32 %v397_v34  ;;  %456 = vst.msk [vmem:[%s2033_s10 + $0x38] sm:$0xff] %vm63_vm0, %v440_v35  ;;  %v472_v12 = vmul.f32 %v440_v35, %v1611_v13 }
 0x22f   :  { %v1475_v38 = vpop.eup %1474  ;;  %457 = vst.msk [vmem:[%s2033_s10 + $0x40] sm:$0xff] %vm63_vm0, %v441_v11  ;;  %v473_v41 = vmul.f32 %v441_v11, %v1616_v14 }
 0x230   :  { %v1477_v39 = vpop.eup %1476  ;;  %v400_v54 = vpop.xlane.xlu1 %399  ;;  %1266 = vmatmul.mubr.msk.f32.gmra.mrb[6].mxu1 %vm63_vm0, %v472_v12  ;;  %v442_v45 = vmul.f32 %v1475_v38, %v1790_v31 }
 0x231   :  { %1486 = vrcp.f32 %v400_v54  ;;  %1268 = vmatprep.mubr.msk.f32.mxu1 %vm63_vm0, %v473_v41  ;;  %v443_v61 = vmul.f32 %v1477_v39, %v1792_v51 }
 0x232   :  { %458 = vst.msk [vmem:[%s2033_s10 + $0x48] sm:$0xff] %vm63_vm0, %v442_v45  ;;  %v474_v13 = vmul.f32 %v442_v45, %v1625_v15 }
 0x233   :  { %v1479_v40 = vpop.eup %1478  ;;  %459 = vst.msk [vmem:[%s2033_s10 + $0x50] sm:$0xff] %vm63_vm0, %v443_v61  ;;  %v475_v14 = vmul.f32 %v443_v61, %v1630_v16 }
 0x234   :  { %v1481_v31 = vpop.eup %1480  ;;  %1269 = vmatmul.mubr.msk.f32.gmra.mrb[8].mxu1 %vm63_vm0, %v474_v13  ;;  %v444_v51 = vmul.f32 %v1479_v40, %v1798_v2 }
 0x235   :  { %1271 = vmatprep.mubr.msk.f32.mxu1 %vm63_vm0, %v475_v14  ;;  %v445_v44 = vmul.f32 %v1481_v31, %v1800_v30  ;;  %v1488_v14 = vmov 0.0|0.0   ;;  %v1490_v31 = vmov 0.0  }
 0x236   :  { %460 = vst.msk [vmem:[%s2033_s10 + $0x58] sm:$0xff] %vm63_vm0, %v444_v51  ;;  %v476_v15 = vmul.f32 %v444_v51, %v1639_v17  ;;  %1387 = vmatprep.subr.bf16.mxu1 %v1488_v14  ;;  %v1491_v51 = vmov 0  }
 0x237   :  { %v1483_v25 = vpop.eup %1482  ;;  %461 = vst.msk [vmem:[%s2033_s10 + $0x60] sm:$0xff] %vm63_vm0, %v445_v44  ;;  %v477_v16 = vmul.f32 %v445_v44, %v1644_v18  ;;  %1423 = vset.pattern.permute.xlu0 %v1491_v51  ;;  %v16_v44 = vstv %s2035_s8 }
 0x238   :  { %v1485_v2 = vpop.eup %1484  ;;  %1272 = vmatmul.mubr.msk.f32.gmra.mrb[10].mxu1 %vm63_vm0, %v476_v15  ;;  %v446_v30 = vmul.f32 %v1483_v25, %v1812_v62  ;;  %17 = vst [vmem:[#allocation2] sm:$0x1] %v16_v44  ;;  %v1101_v25 = vld [vmem:[%s2036_s6] ss:$0 sm:$0xff] }
 0x239   :  { %1274 = vmatprep.mubr.msk.f32.mxu1 %vm63_vm0, %v477_v16  ;;  %v447_v46 = vmul.f32 %v1485_v2, %v1814_v63  ;;  %v1084_v63 = vld [vmem:[%s2034_s4] ss:$0 sm:$0xff] }
 0x23a   :  { %462 = vst.msk [vmem:[%s2033_s10 + $0x68] sm:$0xff] %vm63_vm0, %v446_v30  ;;  %v478_v17 = vmul.f32 %v446_v30, %v1653_v19 }
 0x23b   :  { %v1487_v47 = vpop.eup %1486  ;;  %463 = vst.msk [vmem:[%s2033_s10 + $0x70] sm:$0xff] %vm63_vm0, %v447_v46  ;;  %v479_v18 = vmul.f32 %v447_v46, %v1658_v20 }
 0x23c   :  { %1275 = vmatmul.mubr.msk.f32.gmra.mrb[12].mxu1 %vm63_vm0, %v478_v17  ;;  %v448_v62 = vmul.f32 %v1487_v47, %v1826_v24 }
 0x23d   :  { %1277 = vmatprep.mubr.msk.f32.mxu1 %vm63_vm0, %v479_v18 }
 0x23e   :  { %464 = vst.msk [vmem:[%s2033_s10 + $0x78] sm:$0xff] %vm63_vm0, %v448_v62  ;;  %v480_v19 = vmul.f32 %v448_v62, %v1667_v21 }
 0x23f   :  { %v927_v15 = vld [vmem:[#allocation2] sm:$0x1] }
 0x240   :  { %1278 = vmatmul.mubr.msk.f32.gmra.mrb[14].mxu1 %vm63_vm0, %v480_v19  ;;  %930 = vperm.xlu0 %1423, %v927_v15  }
 0x241   :  { %1352 = vmatprep.mubr.msk.f32.mxu1 %vm1489_vm2, %v1490_v31  ;;  %v933_v31 = vlaneseq }
 0x243   :  { %v934_v51 = vshrl.u32 %v933_v31, 7 }
 0x245   :  { %v935_v44 = vsub.s32 0, %v934_v51 }
 0x2bf   :  { %v931_v15 = vpop.permute.xlu0 %930 }
 0x2f7   :  { %v1258_v20 = vpop.f32.mrb[0].mxu1 }
 0x2f8   :  { %v612_v60 = vadd.f32 %v1258_v20, %v1084_v63  ;;  %v606_v3 = vpop.f32.mrb[1].mxu1 }
 0x2f9   :  { %v607_v50 = vadd.f32 %v1084_v63, %v606_v3 }
 0x2fa   :  { %v686_v53 = vmax.f32 %v612_v60, 0.0 }
 0x2fb   :  { %v685_v24 = vmax.f32 %v607_v50, 0.0  ;;  %v1261_v52 = vpop.f32.mrb[2].mxu1 }
 0x2fc   :  { %v622_v37 = vadd.f32 %v1261_v52, %v1084_v63  ;;  %v616_v56 = vpop.f32.mrb[3].mxu1 }
 0x2fd   :  { %v617_v43 = vadd.f32 %v1084_v63, %v616_v56  ;;  %1296 = vmatprep.mubr.msk.f32.mxu0 %vm716_vm1, %v685_v24 }
 0x2fe   :  { %1297 = vmatmul.mubr.msk.f32.vlgmr.msra.gmra.mrb[16].mxu0 %vm716_vm1, %v686_v53  ;;  %v688_v59 = vmax.f32 %v622_v37, 0.0 }
 0x2ff   :  { %v687_v21 = vmax.f32 %v617_v43, 0.0  ;;  %v1264_v57 = vpop.f32.mrb[4].mxu1 }
 0x300   :  { %v632_v0 = vadd.f32 %v1264_v57, %v1084_v63  ;;  %v626_v26 = vpop.f32.mrb[5].mxu1 }
 0x301   :  { %v627_v42 = vadd.f32 %v1084_v63, %v626_v26  ;;  %1299 = vmatprep.mubr.msk.f32.mxu0 %vm716_vm1, %v687_v21 }
 0x302   :  { %1300 = vmatmul.mubr.msk.f32.gmra.mrb[18].mxu0 %vm716_vm1, %v688_v59  ;;  %v690_v49 = vmax.f32 %v632_v0, 0.0 }
 0x303   :  { %v689_v5 = vmax.f32 %v627_v42, 0.0  ;;  %v1267_v36 = vpop.f32.mrb[6].mxu1 }
 0x304   :  { %v642_v4 = vadd.f32 %v1267_v36, %v1084_v63  ;;  %v636_v58 = vpop.f32.mrb[7].mxu1 }
 0x305   :  { %v637_v6 = vadd.f32 %v1084_v63, %v636_v58  ;;  %1302 = vmatprep.mubr.msk.f32.mxu0 %vm716_vm1, %v689_v5 }
 0x306   :  { %1303 = vmatmul.mubr.msk.f32.gmra.mrb[20].mxu0 %vm716_vm1, %v690_v49  ;;  %v692_v27 = vmax.f32 %v642_v4, 0.0 }
 0x307   :  { %v691_v8 = vmax.f32 %v637_v6, 0.0  ;;  %v1270_v7 = vpop.f32.mrb[8].mxu1 }
 0x308   :  { %v652_v1 = vadd.f32 %v1270_v7, %v1084_v63  ;;  %v646_v28 = vpop.f32.mrb[9].mxu1 }
 0x309   :  { %v647_v48 = vadd.f32 %v1084_v63, %v646_v28  ;;  %1305 = vmatprep.mubr.msk.f32.mxu0 %vm716_vm1, %v691_v8 }
 0x30a   :  { %1306 = vmatmul.mubr.msk.f32.gmra.mrb[22].mxu0 %vm716_vm1, %v692_v27  ;;  %v694_v9 = vmax.f32 %v652_v1, 0.0 }
 0x30b   :  { %v693_v23 = vmax.f32 %v647_v48, 0.0  ;;  %v1273_v55 = vpop.f32.mrb[10].mxu1 }
 0x30c   :  { %v662_v10 = vadd.f32 %v1273_v55, %v1084_v63  ;;  %v656_v29 = vpop.f32.mrb[11].mxu1 }
 0x30d   :  { %v657_v32 = vadd.f32 %v1084_v63, %v656_v29  ;;  %1308 = vmatprep.mubr.msk.f32.mxu0 %vm716_vm1, %v693_v23 }
 0x30e   :  { %1309 = vmatmul.mubr.msk.f32.gmra.mrb[24].mxu0 %vm716_vm1, %v694_v9  ;;  %v696_v34 = vmax.f32 %v662_v10, 0.0 }
 0x30f   :  { %v695_v22 = vmax.f32 %v657_v32, 0.0  ;;  %v1276_v33 = vpop.f32.mrb[12].mxu1 }
 0x310   :  { %v672_v35 = vadd.f32 %v1276_v33, %v1084_v63  ;;  %v666_v11 = vpop.f32.mrb[13].mxu1 }
 0x311   :  { %v667_v12 = vadd.f32 %v1084_v63, %v666_v11  ;;  %1311 = vmatprep.mubr.msk.f32.mxu0 %vm716_vm1, %v695_v22 }
 0x312   :  { %1312 = vmatmul.mubr.msk.f32.gmra.mrb[26].mxu0 %vm716_vm1, %v696_v34  ;;  %v698_v39 = vmax.f32 %v672_v35, 0.0 }
 0x313   :  { %v697_v38 = vmax.f32 %v667_v12, 0.0  ;;  %v1279_v41 = vpop.f32.mrb[14].mxu1 }
 0x314   :  { %v682_v54 = vadd.f32 %v1279_v41, %v1084_v63  ;;  %v676_v45 = vpop.f32.mrb[15].mxu1 }
 0x315   :  { %v677_v61 = vadd.f32 %v1084_v63, %v676_v45  ;;  %1314 = vmatprep.mubr.msk.f32.mxu0 %vm716_vm1, %v697_v38 }
 0x316   :  { %1315 = vmatmul.mubr.msk.f32.gmra.mrb[28].mxu0 %vm716_vm1, %v698_v39  ;;  %v700_v40 = vmax.f32 %v682_v54, 0.0 }
 0x317   :  { %v699_v13 = vmax.f32 %v677_v61, 0.0 }
 0x319   :  { %1317 = vmatprep.mubr.msk.f32.mxu0 %vm716_vm1, %v699_v13 }
 0x31a   :  { %1318 = vmatmul.mubr.msk.f32.gmra.mrb[30].mxu0 %vm716_vm1, %v700_v40  ;;  %v926_v40 = vld [vmem:[%s2037_s7] sm:$0x1] }
 0x3d1   :  { %v1298_v16 = vpop.f32.mrb[16].mxu0 }
 0x3d2   :  { %v837_v2 = vadd.f32 %v1298_v16, %v1101_v25  ;;  %v831_v30 = vpop.f32.mrb[17].mxu0 }
 0x3d3   :  { %v832_v46 = vadd.f32 %v1101_v25, %v831_v30 }
 0x3d4   :  { %v911_v17 = vmax.f32 %v837_v2, 0.0 }
 0x3d5   :  { %v910_v47 = vmax.f32 %v832_v46, 0.0  ;;  %v1301_v18 = vpop.f32.mrb[18].mxu0 }
 0x3d6   :  { %v847_v62 = vadd.f32 %v1301_v18, %v1101_v25  ;;  %v841_v19 = vpop.f32.mrb[19].mxu0 }
 0x3d7   :  { %v1388_v20 = vpack.c.bf16 %v911_v17, %v910_v47  ;;  %v842_v60 = vadd.f32 %v1101_v25, %v841_v19 }
 0x3d8   :  { %v913_v3 = vmax.f32 %v847_v62, 0.0 }
 0x3d9   :  { %v912_v50 = vmax.f32 %v842_v60, 0.0  ;;  %v1304_v24 = vpop.f32.mrb[20].mxu0  ;;  %1390 = vmatpush3.bf16.xpose.msk.msra.mxu1 %vm1994_vm3, %v1388_v20 }
 0x3da   :  { %v857_v52 = vadd.f32 %v1304_v24, %v1101_v25  ;;  %v851_v53 = vpop.f32.mrb[21].mxu0  ;;  %1391 = vmatprep.subr.bf16.mxu1 %v1488_v14 }
 0x3db   :  { %v1392_v37 = vpack.c.bf16 %v913_v3, %v912_v50  ;;  %v852_v56 = vadd.f32 %v1101_v25, %v851_v53 }
 0x3dc   :  { %v915_v43 = vmax.f32 %v857_v52, 0.0 }
 0x3dd   :  { %v914_v21 = vmax.f32 %v852_v56, 0.0  ;;  %v1307_v57 = vpop.f32.mrb[22].mxu0 }
 0x3de   :  { %v867_v59 = vadd.f32 %v1307_v57, %v1101_v25  ;;  %v861_v0 = vpop.f32.mrb[23].mxu0 }
 0x3df   :  { %v1396_v26 = vpack.c.bf16 %v915_v43, %v914_v21  ;;  %v862_v42 = vadd.f32 %v1101_v25, %v861_v0 }
 0x3e0   :  { %v917_v5 = vmax.f32 %v867_v59, 0.0 }
 0x3e1   :  { %v916_v36 = vmax.f32 %v862_v42, 0.0  ;;  %v1310_v49 = vpop.f32.mrb[24].mxu0  ;;  %1394 = vmatpush3.bf16.xpose.msk.msra.mxu1 %vm1994_vm3, %v1392_v37 }
 0x3e2   :  { %v877_v4 = vadd.f32 %v1310_v49, %v1101_v25  ;;  %v871_v58 = vpop.f32.mrb[25].mxu0  ;;  %1395 = vmatprep.subr.bf16.mxu1 %v1488_v14 }
 0x3e3   :  { %v1400_v6 = vpack.c.bf16 %v917_v5, %v916_v36  ;;  %v872_v8 = vadd.f32 %v1101_v25, %v871_v58 }
 0x3e4   :  { %v919_v7 = vmax.f32 %v877_v4, 0.0 }
 0x3e5   :  { %v918_v27 = vmax.f32 %v872_v8, 0.0  ;;  %v1313_v1 = vpop.f32.mrb[26].mxu0 }
 0x3e6   :  { %v887_v28 = vadd.f32 %v1313_v1, %v1101_v25  ;;  %v881_v48 = vpop.f32.mrb[27].mxu0 }
 0x3e7   :  { %v1404_v23 = vpack.c.bf16 %v919_v7, %v918_v27  ;;  %v882_v55 = vadd.f32 %v1101_v25, %v881_v48 }
 0x3e8   :  { %v921_v9 = vmax.f32 %v887_v28, 0.0 }
 0x3e9   :  { %v920_v10 = vmax.f32 %v882_v55, 0.0  ;;  %v1316_v29 = vpop.f32.mrb[28].mxu0  ;;  %1398 = vmatpush3.bf16.xpose.msk.msra.mxu1 %vm1994_vm3, %v1396_v26 }
 0x3ea   :  { %v897_v32 = vadd.f32 %v1316_v29, %v1101_v25  ;;  %v891_v22 = vpop.f32.mrb[29].mxu0  ;;  %1399 = vmatprep.subr.bf16.mxu1 %v1488_v14 }
 0x3eb   :  { %v1408_v33 = vpack.c.bf16 %v921_v9, %v920_v10  ;;  %v892_v34 = vadd.f32 %v1101_v25, %v891_v22 }
 0x3ec   :  { %v923_v35 = vmax.f32 %v897_v32, 0.0 }
 0x3ed   :  { %v922_v11 = vmax.f32 %v892_v34, 0.0  ;;  %v1319_v12 = vpop.f32.mrb[30].mxu0 }
 0x3ee   :  { %v907_v38 = vadd.f32 %v1319_v12, %v1101_v25  ;;  %v901_v41 = vpop.f32.mrb[31].mxu0 }
 0x3ef   :  { %v1412_v39 = vpack.c.bf16 %v923_v35, %v922_v11  ;;  %v902_v54 = vadd.f32 %v1101_v25, %v901_v41  ;;  %v936_v25 = vrot.slane %v931_v15, %v935_v44 }
 0x3f0   :  { %v925_v45 = vmax.f32 %v907_v38, 0.0 }
 0x3f1   :  { %v924_v61 = vmax.f32 %v902_v54, 0.0  ;;  %1402 = vmatpush3.bf16.xpose.msk.msra.mxu1 %vm1994_vm3, %v1400_v6 }
 0x3f2   :  { %1403 = vmatprep.subr.bf16.mxu1 %v1488_v14 }
 0x3f3   :  { %v1416_v13 = vpack.c.bf16 %v925_v45, %v924_v61 }
 0x3f9   :  { %1406 = vmatpush3.bf16.xpose.msk.msra.mxu1 %vm1994_vm3, %v1404_v23 }
 0x3fa   :  { %1407 = vmatprep.subr.bf16.mxu1 %v1488_v14 }
 0x401   :  { %1410 = vmatpush3.bf16.xpose.msk.msra.mxu1 %vm1994_vm3, %v1408_v33 }
 0x402   :  { %1411 = vmatprep.subr.bf16.mxu1 %v1488_v14 }
 0x409   :  { %1414 = vmatpush3.bf16.xpose.msk.msra.mxu1 %vm1994_vm3, %v1412_v39 }
 0x40a   :  { %1415 = vmatprep.subr.bf16.mxu1 %v1488_v14 }
 0x411   :  { %1418 = vmatpush3.bf16.xpose.msk.msra.mxu1 %vm1994_vm3, %v1416_v13 }
 0x418   :  { %1353 = vmatmul.mubr.msk.f32.vlgmr.msra.gmra.mrb[16].mxu1 %vm63_vm0, %v926_v40 }
 0x4eb   :  { %v1054_v16 = vpop.f32.mrb[16].mxu1 }
 0x4ec   :  { %v1055_v2 = vadd.f32 %v1054_v16, %v936_v25  ;;  %v1354_v30 = vpop.f32.mrb[17].mxu1 }
 0x4ee   :  { %1058 = vst [vmem:[%s2038_s9] sm:$0x1] %v1055_v2 }

</bundles_post_ra>
